<compile_context>
chip_gen: v7x
topology: tpu7x:2x2x1
jax: 0.10.0
libtpu: 0.0.40
codegen_flags: <defaults>
</compile_context>

<pallas_src>
import math
import functools
import jax
import jax.numpy as jnp
from jax import lax
from jax.experimental import pallas as pl
from jax.experimental.pallas import tpu as pltpu


def _round_up(x, m):
    return ((x + m - 1) // m) * m


# ---------------------------------------------------------------------------
# Fused Siren forward kernel.
#   x block: (tm, tk), weight block: (tn, tk)  (PyTorch (out, in) layout),
#   bias block: (1, tn), output block: (tm, tn).
# ---------------------------------------------------------------------------
def _siren_kernel(x_ref, w_ref, b_ref, o_ref, acc_ref=None, *, w0, nk, mxu_bf16):
    xb = x_ref[...]
    wb = w_ref[...]
    if mxu_bf16:
        # Optional bf16 MXU path (v5e/v6e compute win); f32 accumulation kept.
        xb = xb.astype(jnp.bfloat16)
        wb = wb.astype(jnp.bfloat16)
    # Contract dim 1 of both operands -> (tm, tn); no wrapper-side transpose.
    prod = lax.dot_general(xb, wb, (((1,), (1,)), ((), ())),
                           preferred_element_type=jnp.float32)

    if nk == 1:
        # Single K step: skip the VMEM accumulator round-trip, fuse epilogue.
        acc = prod + b_ref[...].astype(jnp.float32)
        o_ref[...] = jnp.sin(w0 * acc).astype(o_ref.dtype)
    else:
        k = pl.program_id(2)

        @pl.when(k == 0)
        def _():
            acc_ref[...] = prod          # assign on first step (no zero + RMW pass)

        @pl.when(k > 0)
        def _():
            acc_ref[...] += prod

        @pl.when(k == nk - 1)
        def _():
            acc = acc_ref[...] + b_ref[...].astype(jnp.float32)
            o_ref[...] = jnp.sin(w0 * acc).astype(o_ref.dtype)


def siren_forward(x, weight, bias=None, w0=1.0, *,
                  tm_max=512, tn_max=1024, tk_max=2048,
                  weight_vmem_budget=16 << 20, mxu_bf16=False):
    """Fused Pallas equivalent of Siren.forward: sin(w0 * (F.linear(x, W, b)))."""
    orig_shape = x.shape
    K = orig_shape[-1]
    N = weight.shape[0]
    assert weight.shape == (N, K)

    M = 1
    for d in orig_shape[:-1]:
        M *= d
    x2d = x.reshape(M, K)
    b = bias if bias is not None else jnp.zeros((N,), dtype=weight.dtype)
    b2d = b.reshape(1, N)

    in_bytes = jnp.dtype(x.dtype).itemsize
    w_bytes = jnp.dtype(weight.dtype).itemsize
    out_bytes = in_bytes

    # K tile: full-extent when it fits (no padding at all); otherwise a
    # 128-aligned tile with zero-padded K (garbage along the contraction axis
    # would corrupt valid outputs, so K is the only dim that may be padded).
    if K <= tk_max:
        tk, K_pad = K, K
    else:
        tk, K_pad = tk_max, _round_up(K, tk_max)
        x2d = jnp.pad(x2d, ((0, 0), (0, K_pad - K)))
        weight = jnp.pad(weight, ((0, 0), (0, K_pad - K)))
    nk = K_pad // tk

    # N tile: keep the whole weight VMEM-resident when its double-buffered block
    # fits the budget -> weight block index is constant and it is DMA'd once.
    if 2 * K_pad * N * w_bytes <= weight_vmem_budget or N <= tn_max:
        tn = N
    else:
        tn = tn_max          # stream weight; partial last N block handled by cdiv grid

    # M tile: large row tiles; partial edge block handled by cdiv grid (no pad).
    tm = M if M <= tm_max else tm_max

    def _vmem_est(tm_):
        est = 2 * tm_ * tk * in_bytes                     # x (double-buffered)
        est += 2 * tn * tk * w_bytes                      # weight
        est += 2 * 8 * _round_up(tn, 128) * w_bytes       # bias (sublane-padded)
        est += 2 * tm_ * tn * out_bytes                   # output
        if nk > 1:
            est += tm_ * tn * 4                           # f32 accumulator scratch
        return est

    while _vmem_est(tm) > (40 << 20) and tm > 8:          # safety: stay v7x-legal
        tm = max(8, (tm // 2) // 8 * 8)

    grid = (pl.cdiv(M, tm), pl.cdiv(N, tn), nk)
    scratch = [pltpu.VMEM((tm, tn), jnp.float32)] if nk > 1 else []

    cost = pl.CostEstimate(
        flops=2 * M * K * N,
        transcendentals=M * N,
        bytes_accessed=(M * K * in_bytes + N * K * w_bytes
                        + M * N * out_bytes + N * w_bytes),
    )
    vmem_limit = int(min(max(32 << 20, _vmem_est(tm) + (8 << 20)), 48 << 20))

    out = pl.pallas_call(
        functools.partial(_siren_kernel, w0=float(w0), nk=nk, mxu_bf16=mxu_bf16),
        out_shape=jax.ShapeDtypeStruct((M, N), x.dtype),
        grid=grid,
        in_specs=[
            pl.BlockSpec((tm, tk), lambda i, j, k: (i, k)),
            pl.BlockSpec((tn, tk), lambda i, j, k: (j, k)),   # weight in (N, K) layout
            pl.BlockSpec((1, tn), lambda i, j, k: (0, j)),
        ],
        out_specs=pl.BlockSpec((tm, tn), lambda i, j, k: (i, j)),
        scratch_shapes=scratch,
        compiler_params=pltpu.CompilerParams(
            dimension_semantics=("parallel", "parallel", "arbitrary"),
            vmem_limit_bytes=vmem_limit,
        ),
        cost_estimate=cost,
    )(x2d, weight, b2d)

    return out.reshape(orig_shape[:-1] + (N,))


# ---------------------------------------------------------------------------
# Standalone elementwise Sine kernel (the `Sine` sub-module).
#   * n % 1024 == 0: lane-dense (n/1024, 1024) slab -> unmasked full-width stores
#   * otherwise: (prod(leading), last_dim) view with partial row blocks --
#     no jnp.pad and no output slice in either case.
# ---------------------------------------------------------------------------
def _sine_kernel(x_ref, o_ref, *, w0):
    o_ref[...] = jnp.sin(w0 * x_ref[...])


def sine(x, w0=1.0, *, block_rows=1024):
    if x.size == 0:
        return x
    orig_shape = x.shape
    WIDTH = 1024
    n = x.size
    if n % WIDTH == 0:
        x2d = x.reshape(n // WIDTH, WIDTH)
    elif x.ndim >= 2:
        x2d = x.reshape(-1, orig_shape[-1])
    else:
        # TODO(synk): a huge 1-D array with n % 1024 != 0 becomes a single wide
        # row block; acceptable for typical activation sizes.
        x2d = x.reshape(1, -1)
    rows, width = x2d.shape

    itemsize = jnp.dtype(x.dtype).itemsize
    tr = rows if rows <= block_rows else block_rows
    while tr > 8 and 4 * tr * width * itemsize > (32 << 20):
        tr = max(8, (tr // 2) // 8 * 8)
    grid = (pl.cdiv(rows, tr),)
    vmem_limit = int(min(max(32 << 20, 4 * tr * width * itemsize + (4 << 20)), 48 << 20))

    out2d = pl.pallas_call(
        functools.partial(_sine_kernel, w0=float(w0)),
        out_shape=jax.ShapeDtypeStruct((rows, width), x.dtype),
        grid=grid,
        in_specs=[pl.BlockSpec((tr, width), lambda i: (i, 0))],
        out_specs=pl.BlockSpec((tr, width), lambda i: (i, 0)),
        compiler_params=pltpu.CompilerParams(
            dimension_semantics=("parallel",),
            vmem_limit_bytes=vmem_limit,
        ),
    )(x2d)
    return out2d.reshape(orig_shape)


if __name__ == "__main__":
    key = jax.random.PRNGKey(0)
    k_x, k_w, k_b, k_z = jax.random.split(key, 4)

    # Small shapes consistent with a SIREN layer (batch of coordinate tokens).
    batch, seq, dim_in, dim_out = 2, 8, 32, 64
    w0, c, is_first = 30.0, 6.0, True

    x = jax.random.normal(k_x, (batch, seq, dim_in), dtype=jnp.float32)
    # Mirror Siren.init_: uniform(-w_std, w_std).
    w_std = (1.0 / dim_in) if is_first else (math.sqrt(c / dim_in) / w0)
    weight = jax.random.uniform(k_w, (dim_out, dim_in), jnp.float32, -w_std, w_std)
    bias = jax.random.uniform(k_b, (dim_out,), jnp.float32, -w_std, w_std)

    # Fused Siren forward: linear + bias + sine epilogue in one Pallas kernel.
    y = siren_forward(x, weight, bias, w0=w0)
    jax.block_until_ready(y)

    y_ref = jnp.sin(
        w0 * (jnp.dot(x, weight.T, precision=lax.Precision.HIGHEST) + bias)
    )
    assert y.shape == (batch, seq, dim_out) and y.dtype == x.dtype
    assert float(jnp.max(jnp.abs(y - y_ref))) < 1e-3

    # Standalone Sine activation kernel check (module's Sine(w0)).
    z = jax.random.normal(k_z, (2, 4, 16, 16), dtype=jnp.float32)
    s = sine(z, w0=w0)
    jax.block_until_ready(s)
    assert s.shape == z.shape and s.dtype == z.dtype
    assert float(jnp.max(jnp.abs(s - jnp.sin(w0 * z)))) < 1e-5

    print("KERNEL_OK")
</pallas_src>

<mosaic_0001>
module attributes {stable_mosaic.version = 11 : i64} {
  func.func @_siren_kernel(%arg0: i32, %arg1: i32, %arg2: i32, %arg3: memref<16x32xf32, #tpu.memory_space<vmem>>, %arg4: memref<64x32xf32, #tpu.memory_space<vmem>>, %arg5: memref<1x64xf32, #tpu.memory_space<vmem>>, %arg6: memref<16x64xf32, #tpu.memory_space<vmem>>) attributes {dimension_semantics = [#tpu.dimension_semantics<parallel>, #tpu.dimension_semantics<parallel>, #tpu.dimension_semantics<arbitrary>], iteration_bounds = array<i64: 1, 1, 1>, scalar_prefetch = 0 : i64, scratch_operands = 0 : i64, tpu.core_type = #tpu.core_type<tc>, window_params = [{transform_indices = @transform_0, window_bounds = array<i64: 16, 32>}, {transform_indices = @transform_1, window_bounds = array<i64: 64, 32>}, {transform_indices = @transform_2, window_bounds = array<i64: 1, 64>}, {transform_indices = @transform_3, window_bounds = array<i64: 16, 64>}]} {
    %c0 = arith.constant 0 : index
    %c0_0 = arith.constant 0 : index
    %0 = vector.load %arg3[%c0, %c0_0] : memref<16x32xf32, #tpu.memory_space<vmem>>, vector<16x32xf32>
    %c0_1 = arith.constant 0 : index
    %c0_2 = arith.constant 0 : index
    %1 = vector.load %arg4[%c0_1, %c0_2] : memref<64x32xf32, #tpu.memory_space<vmem>>, vector<64x32xf32>
    %cst = arith.constant dense<0.000000e+00> : vector<16x64xf32>
    %2 = tpu.matmul %0, %1, %cst {dimension_numbers = #tpu.dot_dimension_numbers<[1], [1], [0], [0], [0, 0, 1, 0], [], []>} : vector<16x32xf32>, vector<64x32xf32>, vector<16x64xf32> -> vector<16x64xf32>
    %c0_3 = arith.constant 0 : index
    %c0_4 = arith.constant 0 : index
    %3 = vector.load %arg5[%c0_3, %c0_4] : memref<1x64xf32, #tpu.memory_space<vmem>>, vector<1x64xf32>
    %4 = vector.broadcast %3 : vector<1x64xf32> to vector<16x64xf32>
    %5 = arith.addf %2, %4 : vector<16x64xf32>
    %cst_5 = arith.constant 3.000000e+01 : f32
    %6 = vector.broadcast %cst_5 : f32 to vector<16x64xf32>
    %7 = arith.mulf %6, %5 : vector<16x64xf32>
    %8 = math.sin %7 : vector<16x64xf32>
    %c0_6 = arith.constant 0 : index
    %c0_7 = arith.constant 0 : index
    %9 = vector.load %arg6[%c0_6, %c0_7] : memref<16x64xf32, #tpu.memory_space<vmem>>, vector<16x64xf32>
    tpu.vector_store %arg6[%c0_6, %c0_7], %8 {strides = array<i32>} : memref<16x64xf32, #tpu.memory_space<vmem>>, vector<16x64xf32>,
    return
  }
  func.func @transform_0(%arg0: i32, %arg1: i32, %arg2: i32) -> (i32, i32) {
    %c0_i32 = arith.constant 0 : i32
    return %arg0, %arg2 : i32, i32
  }
  func.func @transform_1(%arg0: i32, %arg1: i32, %arg2: i32) -> (i32, i32) {
    %c0_i32 = arith.constant 0 : i32
    return %arg1, %arg2 : i32, i32
  }
  func.func @transform_2(%arg0: i32, %arg1: i32, %arg2: i32) -> (i32, i32) {
    %c0_i32 = arith.constant 0 : i32
    %c0_i32_0 = arith.constant 0 : i32
    return %c0_i32, %arg1 : i32, i32
  }
  func.func @transform_3(%arg0: i32, %arg1: i32, %arg2: i32) -> (i32, i32) {
    %c0_i32 = arith.constant 0 : i32
    return %arg0, %arg1 : i32, i32
  }
}

</mosaic_0001>

<bundles_post_ra>
// kernel: tpu_custom_call.1
= control target key start
LH: loop header
LB: loop body
LE: loop exit
PB: predicated region body
PF: predicated region fallthrough
CT: control target
= control target key end

     0   :  { %vm32_vm0 = vcmask 261120   ;;  %s650_s0 = inlined_call_operand.vmem [shape: f32[16,32], index: 0, kind: input, shape index: {}]   ;;  %s651_s1 = inlined_call_operand.vmem [shape: f32[64,32], index: 1, kind: input, shape index: {}]   ;;  %s652_s2 = inlined_call_operand.vmem [shape: f32[1,64], index: 2, kind: input, shape index: {}]   ;;  %s653_s3 = inlined_call_operand.hbm [shape: f32[16,64], index: 3, kind: output, shape index: {}]  }
   0x1   :  { %v17_v0 = vld [vmem:[%s651_s1] sm:$0xff]  ;;  %v18_v1 = vld [vmem:[%s651_s1 + $0x8] sm:$0xff]  ;;  %v19_v2 = vld [vmem:[%s651_s1 + $0x10] sm:$0xff] }
   0x2   :  { %v415_v3 = vpack.c.bf16 %v18_v1, %v17_v0  ;;  %vm528_vm1 = vmpackc.low %vm32_vm0, %vm32_vm0  ;;  %v20_v5 = vld [vmem:[%s651_s1 + $0x18] sm:$0xff]  ;;  %v15_v7 = vld [vmem:[%s650_s0] sm:$0xff] }
   0x3   :  { %v421_v6 = vpack.c.bf16 %v20_v5, %v19_v2 }
   0x4   :  { %417 = vmatprep.subr.msk.bf16.mxu0 %vm528_vm1, %v415_v3 }
   0x5   :  { %8 = vsyncpa [#allocation3], 0  ;;  %420 = vmatpush3.bf16.xpose.msk.msra.mxu0 %vm528_vm1, %v415_v3  ;;  %412 = vmatprep.mubr.msk.f32.mxu0 %vm32_vm0, %v15_v7  ;;  %v21_v8 = vld [vmem:[%s651_s1 + $0x20] sm:$0xff]  ;;  %v22_v9 = vld [vmem:[%s651_s1 + $0x28] sm:$0xff]  ;;  %v488_v42 = vmov 683565275  }
   0x6   :  { %423 = vmatprep.subr.msk.bf16.mxu0 %vm528_vm1, %v421_v6  ;;  %v427_v10 = vpack.c.bf16 %v22_v9, %v21_v8  ;;  %v23_v11 = vld [vmem:[%s651_s1 + $0x30] sm:$0xff]  ;;  %v24_v12 = vld [vmem:[%s651_s1 + $0x38] sm:$0xff]  ;;  %v16_v14 = vld [vmem:[%s650_s0 + $0x8] sm:$0xff]  ;;  %v489_v46 = vmov 2475754826   ;;  %s494_s0 = smov [#allocation2]  }
   0x7   :  { %v433_v13 = vpack.c.bf16 %v24_v12, %v23_v11  ;;  %v367_v15 = vld [vmem:[%s652_s2] ss:$0 sm:$0xff]  ;;  %v490_v48 = vmov 2131351028   ;;  %v491_v50 = vmov 2102212464  }
   0x8   :  { %v492_v52 = vmov 920167782   ;;  %v493_v59 = vmov 1326507024   ;;  %s356_s1 = sshll.u32 %s494_s0, 4  ;;  %s357_s1 = int_to_ptr.vmem [resolvable:$true] %s356_s1 }
   0x9   :  { %s464_s2 = scalar_lea.vmem %s357_s1, 256  ;;  %p469_p1 = scmp.lt.s32.totalorder %s357_s1, %s357_s1 }
   0xa   :  { %p465_p0 = scmp.ne.s32.totalorder %s357_s1, %s464_s2  ;;  %p470_p2 = scmp.lt.s32.totalorder %s464_s2, %s464_s2 }
   0xc   :  { %p471_p3 = por %p470_p2, %p469_p1 }
   0xd   :  { %426 = vmatpush3.bf16.xpose.msk.msra.mxu0 %vm528_vm1, %v421_v6 }
   0xe   :  { %429 = vmatprep.subr.msk.bf16.mxu0 %vm528_vm1, %v427_v10  ;;  %p472_p4 = pnand %p471_p3, %p465_p0 }
  0x15   :  { %432 = vmatpush3.bf16.xpose.msk.msra.mxu0 %vm528_vm1, %v427_v10 }
  0x16   :  { %435 = vmatprep.subr.msk.bf16.mxu0 %vm528_vm1, %v433_v13 }
  0x1d   :  { %438 = vmatpush3.bf16.xpose.msk.msra.mxu0 %vm528_vm1, %v433_v13 }
  0x24   :  { %413 = vmatmul.mubr.msk.f32.vlgmr.msra.gmra.mrb[0].mxu0 %vm32_vm0, %v16_v14 }
  0xf7   :  { %v414_v16 = vpop.f32.mrb[0].mxu0 }
  0xf8   :  { %v135_v17 = vadd.f32 %v414_v16, %v367_v15  ;;  %v129_v18 = vpop.f32.mrb[1].mxu0 }
  0xf9   :  { %v130_v19 = vadd.f32 %v367_v15, %v129_v18 }
  0xfa   :  { %v574_v20 = vmul.f32 30.0, %v135_v17 }
  0xfb   :  { %v576_v21 = vmul.f32 30.0, %v130_v19 }
  0xfc   :  { %v244_v22 = vand.u32 2147483647, %v574_v20  ;;  %v247_v23 = vand.u32 2139095040, %v574_v20  ;;  %vm246_vm0 = vcmp.lt.s32.totalorder %v574_v20, 0 }
  0xfd   :  { %v143_v24 = vand.u32 2139095040, %v576_v21  ;;  %v140_v27 = vand.u32 2147483647, %v576_v21 }
  0xfe   :  { %v248_v25 = vshrl.u32 %v247_v23, 23  ;;  %v251_v26 = vand.u32 8388607, %v244_v22  ;;  %vm245_vm1 = vcmp.le.f32.partialorder %v244_v22, 0.7853982 }
  0xff   :  { %v144_v28 = vshrl.u32 %v143_v24, 23  ;;  %v586_v33 = vand.u32 8388607, %v140_v27 }
 0x100   :  { %v382_v29 = vadd.s32 4294967169, %v248_v25  ;;  %v252_v32 = vor.u32 8388608, %v251_v26 }
 0x101   :  { %v378_v30 = vadd.s32 4294967169, %v144_v28  ;;  %v148_v40 = vor.u32 8388608, %v586_v33 }
 0x102   :  { %v254_v31 = vadd.s32 1, %v382_v29  ;;  %v588_v39 = vshll.u32 %v252_v32, 8 }
 0x103   :  { %v150_v34 = vadd.s32 1, %v378_v30 }
 0x104   :  { %vm255_vm2 = vcmp.gt.s32.totalorder %v254_v31, 0 }
 0x105   :  { %v256_v35 = vsel %vm255_vm2, %v254_v31, 0  ;;  %vm151_vm3 = vcmp.gt.s32.totalorder %v150_v34, 0  ;;  %vm142_vm2 = vcmp.lt.s32.totalorder %v576_v21, 0 }
 0x106   :  { %v257_v36 = vshrl.u32 %v256_v35, 5  ;;  %v258_v37 = vand.u32 31, %v256_v35  ;;  %v152_v38 = vsel %vm151_vm3, %v150_v34, 0  ;;  %v188_v34 = vshll.u32 %v148_v40, 8 }
 0x107   :  { %v591_v44 = vshrl.u32 %v152_v38, 5  ;;  %v154_v45 = vand.u32 31, %v152_v38  ;;  %vm141_vm3 = vcmp.le.f32.partialorder %v140_v27, 0.7853982 }
 0x108   :  { %v259_v41 = vsub.s32 32, %v258_v37  ;;  %v261_v43 = vshll.u32 %v488_v42, %v258_v37  ;;  %v264_v47 = vshll.u32 %v489_v46, %v258_v37  ;;  %v267_v49 = vshll.u32 %v490_v48, %v258_v37 }
 0x109   :  { %v270_v51 = vshll.u32 %v491_v50, %v258_v37  ;;  %v273_v53 = vshll.u32 %v492_v52, %v258_v37  ;;  %vm276_vm4 = vcmp.lt.s32.totalorder %v257_v36, 1  ;;  %vm277_vm5 = vcmp.lt.s32.totalorder %v257_v36, 2 }
 0x10a   :  { %v262_v54 = vshrl.u32 %v489_v46, %v259_v41  ;;  %v265_v55 = vshrl.u32 %v490_v48, %v259_v41  ;;  %v268_v56 = vshrl.u32 %v491_v50, %v259_v41  ;;  %v260_v57 = vshrl.u32 %v488_v42, %v259_v41 }
 0x10b   :  { %v271_v58 = vshrl.u32 %v492_v52, %v259_v41  ;;  %v274_v60 = vshrl.u32 %v493_v59, %v259_v41  ;;  %v155_v0 = vsub.s32 32, %v154_v45  ;;  %vm278_vm6 = vcmp.lt.s32.totalorder %v257_v36, 3 }
 0x10c   :  { %v263_v61 = vor.u32 %v262_v54, %v261_v43  ;;  %v266_v62 = vor.u32 %v265_v55, %v264_v47  ;;  %v269_v63 = vor.u32 %v268_v56, %v267_v49  ;;  %vm279_vm7 = vcmp.lt.s32.totalorder %v257_v36, 4 }
 0x10d   :  { %v272_v1 = vor.u32 %v271_v58, %v270_v51  ;;  %v275_v2 = vor.u32 %v274_v60, %v273_v53  ;;  %v157_v10 = vshll.u32 %v488_v42, %v154_v45  ;;  %v158_v13 = vshrl.u32 %v489_v46, %v155_v0 }
 0x10e   :  { %v280_v3 = vsel %vm276_vm4, %v260_v57, %v263_v61  ;;  %v281_v4 = vsel %vm279_vm7, %v269_v63, 2102212464  ;;  %v284_v5 = vsel %vm276_vm4, %v263_v61, %v266_v62  ;;  %v288_v6 = vsel %vm276_vm4, %v266_v62, %v269_v63 }
 0x10f   :  { %v282_v7 = vsel %vm278_vm6, %v266_v62, %v281_v4  ;;  %v285_v8 = vsel %vm279_vm7, %v272_v1, 920167782  ;;  %v289_v9 = vsel %vm279_vm7, %v275_v2, 1326507024  ;;  %v160_v14 = vshll.u32 %v489_v46, %v154_v45 }
 0x110   :  { %v286_v11 = vsel %vm278_vm6, %v269_v63, %v285_v8  ;;  %v290_v12 = vsel %vm278_vm6, %v272_v1, %v289_v9  ;;  %v283_v15 = vsel %vm277_vm5, %v280_v3, %v282_v7  ;;  %v161_v18 = vshrl.u32 %v490_v48, %v155_v0 }
 0x111   :  { %v287_v16 = vsel %vm277_vm5, %v284_v5, %v286_v11  ;;  %v291_v17 = vsel %vm277_vm5, %v288_v6, %v290_v12  ;;  %v159_v26 = vor.u32 %v158_v13, %v157_v10  ;;  %v163_v29 = vshll.u32 %v490_v48, %v154_v45 }
 0x112   :  { %v600_v19 = vmul.u32.u64.low %v588_v39, %v291_v17  ;;  %v601_v23 = vmul.u32.u64.high %v588_v39, %v291_v17, %v600_v19  ;;  %v604_v24 = vmul.u32.u64.low %v588_v39, %v287_v16  ;;  %v605_v25 = vmul.u32.u64.high %v588_v39, %v287_v16, %v604_v24 }
 0x113   :  { %v162_v28 = vor.u32 %v161_v18, %v160_v14  ;;  %v164_v30 = vshrl.u32 %v491_v50, %v155_v0  ;;  %v166_v31 = vshll.u32 %v491_v50, %v154_v45  ;;  %v167_v32 = vshrl.u32 %v492_v52, %v155_v0 }
 0x114   :  { %v170_v33 = vshrl.u32 %v493_v59, %v155_v0  ;;  %v299_v35 = vmul.u32 %v588_v39, %v283_v15  ;;  %v156_v36 = vshrl.u32 %v488_v42, %v155_v0  ;;  %v169_v38 = vshll.u32 %v492_v52, %v154_v45 }
 0x115   :  { %v165_v37 = vor.u32 %v164_v30, %v163_v29  ;;  %vm301_vm8 = vc.u32 %v601_v23, %v604_v24  ;;  %v302_v41 = vadd.s32 1, %v605_v25  ;;  %v168_v43 = vor.u32 %v167_v32, %v166_v31 }
 0x116   :  { %vm172_vm9 = vcmp.lt.s32.totalorder %v591_v44, 1  ;;  %v171_v46 = vor.u32 %v170_v33, %v169_v38  ;;  %vm174_vm10 = vcmp.lt.s32.totalorder %v591_v44, 3  ;;  %vm175_vm11 = vcmp.lt.s32.totalorder %v591_v44, 4 }
 0x117   :  { %v180_v47 = vsel %vm172_vm9, %v159_v26, %v162_v28  ;;  %v303_v40 = vsel %vm301_vm8, %v302_v41, %v605_v25  ;;  %v177_v48 = vsel %vm175_vm11, %v165_v37, 2102212464  ;;  %v181_v39 = vsel %vm175_vm11, %v168_v43, 920167782 }
 0x118   :  { %v184_v42 = vsel %vm172_vm9, %v162_v28, %v165_v37  ;;  %v304_v49 = vadd.s32 %v303_v40, %v299_v35  ;;  %vm173_vm12 = vcmp.lt.s32.totalorder %v591_v44, 2  ;;  %v182_v45 = vsel %vm174_vm10, %v165_v37, %v181_v39 }
 0x119   :  { %v185_v50 = vsel %vm175_vm11, %v171_v46, 1326507024  ;;  %v176_v51 = vsel %vm172_vm9, %v156_v36, %v159_v26  ;;  %v178_v52 = vsel %vm174_vm10, %v162_v28, %v177_v48  ;;  %v183_v53 = vsel %vm173_vm12, %v180_v47, %v182_v45 }
 0x11a   :  { %v186_v54 = vsel %vm174_vm10, %v168_v43, %v185_v50  ;;  %v305_v55 = vadd.s32 536870912, %v304_v49  ;;  %v615_v57 = vmul.u32.u64.low %v188_v34, %v183_v53  ;;  %v616_v58 = vmul.u32.u64.high %v188_v34, %v183_v53, %v615_v57 }
 0x11b   :  { %v187_v56 = vsel %vm173_vm12, %v184_v42, %v186_v54  ;;  %v179_v62 = vsel %vm173_vm12, %v176_v51, %v178_v52  ;;  %v300_v14 = vadd.s32 %v604_v24, %v601_v23  ;;  %vm348_vm7 = vcmask 523264  }
 0x11c   :  { %v618_v59 = vmul.u32.u64.low %v188_v34, %v187_v56  ;;  %v619_v60 = vmul.u32.u64.high %v188_v34, %v187_v56, %v618_v59  ;;  %v306_v61 = vshrl.u32 %v305_v55, 30  ;;  %v198_v0 = vadd.s32 1, %v616_v58 }
 0x11d   :  { %v195_v44 = vmul.u32 %v188_v34, %v179_v62  ;;  %vm336_vm8 = vweird.f32 %v574_v20  ;;  %vm232_vm12 = vweird.f32 %v576_v21 }
 0x11e   :  { %v307_v63 = vshll.u32 %v306_v61, 30  ;;  %vm197_vm13 = vc.u32 %v619_v60, %v615_v57  ;;  %v196_v35 = vadd.s32 %v615_v57, %v619_v60  ;;  %v330_v24 = vsub.s32 4, %v306_v61 }
 0x11f   :  { %v199_v2 = vsel %vm197_vm13, %v198_v0, %v616_v58 }
 0x120   :  { %v308_v1 = vsub.s32 %v304_v49, %v307_v63  ;;  %v200_v3 = vadd.s32 %v199_v2, %v195_v44  ;;  %v331_v39 = vsel %vm246_vm0, %v330_v24, %v306_v61 }
 0x121   :  { %v333_v45 = vsel %vm245_vm1, 0, %v331_v39 }
 0x122   :  { %v310_v4 = vsub.s32 0, %v308_v1  ;;  %v201_v5 = vadd.s32 536870912, %v200_v3  ;;  %v337_v54 = vadd.s32 3, %v333_v45 }
 0x124   :  { %v383_v6 = vmin.u32 %v310_v4, %v308_v1  ;;  %v202_v7 = vshrl.u32 %v201_v5, 30  ;;  %v338_v58 = vand.u32 3, %v337_v54 }
 0x126   :  { %v312_v8 = vclz %v383_v6  ;;  %v203_v9 = vshll.u32 %v202_v7, 30  ;;  %v226_v53 = vsub.s32 4, %v202_v7  ;;  %vm343_vm4 = vcmp.eq.s32.totalorder %v338_v58, 2 }
 0x127   :  { %vm340_vm5 = vcmp.eq.s32.totalorder %v338_v58, 0  ;;  %vm339_vm6 = vcmp.lt.s32.totalorder %v338_v58, 2 }
 0x128   :  { %v384_v10 = vadd.s32 4294967294, %v312_v8  ;;  %v204_v11 = vsub.s32 %v200_v3, %v203_v9  ;;  %v227_v56 = vsel %vm142_vm2, %v226_v53, %v202_v7 }
 0x129   :  { %v229_v60 = vsel %vm141_vm3, 0, %v227_v56 }
 0x12a   :  { %vm385_vm14 = vcmp.lt.s32.totalorder %v384_v10, 0  ;;  %v206_v13 = vsub.s32 0, %v204_v11  ;;  %v233_v0 = vadd.s32 3, %v229_v60 }
 0x12b   :  { %v315_v12 = vsel %vm385_vm14, 0, %v384_v10 }
 0x12c   :  { %v316_v15 = vsub.s32 32, %v315_v12  ;;  %v320_v16 = vsub.s32 4294967266, %v315_v12  ;;  %v379_v17 = vmin.u32 %v206_v13, %v204_v11  ;;  %v317_v18 = vshll.u32 %v308_v1, %v315_v12 }
 0x12d   :  { %v234_v3 = vand.u32 3, %v233_v0 }
 0x12e   :  { %v318_v19 = vshrl.u32 %v300_v14, %v316_v15  ;;  %v321_v25 = vadd.s32 127, %v320_v16  ;;  %v208_v26 = vclz %v379_v17 }
 0x12f   :  { %vm239_vm9 = vcmp.eq.s32.totalorder %v234_v3, 2  ;;  %vm236_vm10 = vcmp.eq.s32.totalorder %v234_v3, 0  ;;  %vm235_vm11 = vcmp.lt.s32.totalorder %v234_v3, 2 }
 0x130   :  { %v319_v28 = vor.u32 %v318_v19, %v317_v18  ;;  %v322_v29 = vshll.u32 %v321_v25, 23  ;;  %v380_v30 = vadd.s32 4294967294, %v208_v26 }
 0x132   :  { %v323_v31 = vor.u32 4788187, %v322_v29  ;;  %vm381_vm15 = vcmp.lt.s32.totalorder %v380_v30, 0  ;;  %v326_v33 = vcvt.s32.f32 %v319_v28 }
 0x133   :  { %v211_v34 = vsel %vm381_vm15, 0, %v380_v30 }
 0x134   :  { %v324_v32 = vand.u32 2147483647, %v323_v31  ;;  %v212_v36 = vsub.s32 32, %v211_v34  ;;  %v216_v37 = vsub.s32 4294967266, %v211_v34  ;;  %v213_v38 = vshll.u32 %v204_v11, %v211_v34 }
 0x136   :  { %v327_v23 = vmul.f32 %v326_v33, %v324_v32  ;;  %v214_v41 = vshrl.u32 %v196_v35, %v212_v36  ;;  %v217_v43 = vadd.s32 127, %v216_v37 }
 0x138   :  { %v328_v46 = vxor.u32 2147483648, %v327_v23  ;;  %v215_v47 = vor.u32 %v214_v41, %v213_v38  ;;  %v218_v40 = vshll.u32 %v217_v43, 23 }
 0x13a   :  { %v329_v48 = vsel %vm246_vm0, %v328_v46, %v327_v23  ;;  %v219_v49 = vor.u32 4788187, %v218_v40  ;;  %v222_v51 = vcvt.s32.f32 %v215_v47 }
 0x13b   :  { %v332_v42 = vsel %vm245_vm1, %v574_v20, %v329_v48 }
 0x13c   :  { %456 = vcosq.f32 %v332_v42  ;;  %v220_v50 = vand.u32 2147483647, %v219_v49 }
 0x13d   :  { %458 = vsinq.f32 %v332_v42 }
 0x13e   :  { %v223_v52 = vmul.f32 %v222_v51, %v220_v50 }
 0x140   :  { %v224_v55 = vxor.u32 2147483648, %v223_v52 }
 0x142   :  { %v225_v22 = vsel %vm142_vm2, %v224_v55, %v223_v52 }
 0x143   :  { %v228_v57 = vsel %vm141_vm3, %v576_v21, %v225_v22 }
 0x144   :  { %460 = vcosq.f32 %v228_v57 }
 0x145   :  { %462 = vsinq.f32 %v228_v57 }
 0x146   :  { %v457_v59 = vpop.eup %456 }
 0x147   :  { %v459_v61 = vpop.eup %458  ;;  %v344_v62 = vxor.u32 2147483648, %v457_v59 }
 0x148   :  { %v341_v63 = vxor.u32 2147483648, %v459_v61 }
 0x149   :  { %v345_v44 = vsel %vm343_vm4, %v344_v62, %v459_v61 }
 0x14a   :  { %v342_v1 = vsel %vm340_vm5, %v457_v59, %v341_v63 }
 0x14b   :  { %v346_v27 = vsel %vm339_vm6, %v342_v1, %v345_v44 }
 0x14c   :  { %v347_v2 = vsel %vm336_vm8, nan, %v346_v27 }
 0x14d   :  { %350 = vst.msk [vmem:[#allocation2 + $0x8] sm:$0xff] %vm348_vm7, %v347_v2 }
 0x14e   :  { %v461_v4 = vpop.eup %460 }
 0x14f   :  { %v463_v5 = vpop.eup %462  ;;  %v240_v6 = vxor.u32 2147483648, %v461_v4 }
 0x150   :  { %v237_v7 = vxor.u32 2147483648, %v463_v5 }
 0x151   :  { %v241_v8 = vsel %vm239_vm9, %v240_v6, %v463_v5 }
 0x152   :  { %v238_v9 = vsel %vm236_vm10, %v461_v4, %v237_v7 }
 0x153   :  { %v242_v10 = vsel %vm235_vm11, %v238_v9, %v241_v8 }
 0x154   :  { %v243_v20 = vsel %vm232_vm12, nan, %v242_v10 }
 0x155   :  { %349 = vst.msk [vmem:[#allocation2] sm:$0xff] %vm348_vm7, %v243_v20 }
 0x156   :  { %475 = shalt.err (!%p472_p4)
}
 0x157   :  { %s476_s9 = scalar_lea.hbm %s653_s3, 256 }
 0x158   :  { %p477_p5 = scmp.ne.s32.totalorder %s653_s3, %s476_s9  ;;  %p480_p6 = scmp.lt.u32.totalorder %s476_s9, %s653_s3 }
 0x15a   :  { %p482_p7 = pnand %p480_p6, %p477_p5 }
 0x15c   :  { %485 = shalt.err (!%p482_p7)
}
 0x15d   :  { %s495_s14 = smov 128   ;;  %s496_s15 = smov 8  }
 0x15e   :  { %362 = dma.vmem_to_hbm [thread:$0]  %s357_s1, 256, %s653_s3, [#allocation3], %s495_s14, %s495_s14, %s496_s15  }
 0x15f   :  { %486 = dma.done.wait [#allocation3], 256  }
 0x160   :  { %487 = vsyncadd [#allocation3], 4294967040 }
 0x161   :  { %366 = vsyncpa [#allocation3], 1 }

</bundles_post_ra>
